<compile_context>
chip_gen: v7x
topology: tpu7x:2x2x1
jax: 0.10.0
libtpu: 0.0.40
codegen_flags: <defaults>
</compile_context>

<pallas_src>
import functools

import jax
import jax.numpy as jnp
import numpy as np
from jax.experimental import pallas as pl
from jax.experimental.pallas import tpu as pltpu


def _attention_kernel(x_ref, mask_ref, ut_ref, bu_ref, tv_ref, bt_ref,
                      out_ref, w_ref, *, mxu_dtype):
    Bt, S, D = x_ref.shape
    A = ut_ref.shape[-1]

    x3 = x_ref[...]                              # (Bt, S, D) f32
    x_flat = x3.reshape(Bt * S, D)               # merge batch/seq -> MXU-shaped M

    # U projection on the MXU: (Bt*S, D) @ (D, A), f32 accumulation.
    proj = jnp.dot(x_flat.astype(mxu_dtype), ut_ref[...],
                   preferred_element_type=jnp.float32)
    h = jnp.tanh(proj + bu_ref[...])             # (Bt*S, A), tanh on the EUP

    # scores = T . h + b_t  ->  (Bt, S), lane-dense over the sequence axis.
    h3 = h.reshape(Bt, S, A)
    scores = jnp.sum(h3 * tv_ref[...], axis=-1) + bt_ref[0, 0]   # (Bt, S)

    # Masked softmax over the sequence axis (lanes).  A large finite negative
    # behaves identically to -inf when >=1 position per row is unmasked and is
    # more robust to fully-masked rows.
    scores = jnp.where(mask_ref[...] > 0.0, jnp.float32(-1e30), scores)
    m = jnp.max(scores, axis=-1, keepdims=True)
    e = jnp.exp(scores - m)
    w = e / jnp.sum(e, axis=-1, keepdims=True)   # (Bt, S)
    w_ref[...] = w.astype(w_ref.dtype)           # lane-dense (Bt, S) store

    # outputs = weights @ x : batched (Bt,1,S) @ (Bt,S,D) -> (Bt,1,D) on the MXU.
    out3 = jnp.einsum("bks,bsd->bkd", w.reshape(Bt, 1, S), x3,
                      preferred_element_type=jnp.float32)
    out_ref[...] = out3.reshape(Bt, D).astype(out_ref.dtype)


def _pick_batch_block(B, S, target_rows=512):
    """Pick Bt: divides B, multiple of 8 (or == B), Bt*S modest, and keep
    >= 2 grid steps when possible so v7x can shard the batch across its 2 TCs."""
    if B % 8 != 0:
        return B
    Bt = 8
    while (B % (Bt * 2) == 0
           and (Bt * 2) * S <= target_rows
           and B // (Bt * 2) >= 2):
        Bt *= 2
    return Bt


@functools.partial(jax.jit, static_argnames=("mxu_dtype",))
def attention_forward(x, x_mask, u_w, u_b, t_w, t_b, mxu_dtype=jnp.float32):
    """x: (B,S,D) f32, x_mask: (B,S) bool (True == masked),
    u_w: (A,D), u_b: (A,), t_w: (1,A), t_b: (1,).
    Set mxu_dtype=jnp.bfloat16 on v6e/v7x for the projection matmul."""
    B, S, D = x.shape
    A = u_w.shape[0]
    Bt = _pick_batch_block(B, S)
    grid = (B // Bt,)

    ut = u_w.T.astype(mxu_dtype)                       # (D, A)  (fused under jit)
    bu = u_b.reshape(1, A).astype(jnp.float32)         # (1, A)
    tv = t_w.reshape(1, A).astype(jnp.float32)         # (1, A)
    bt = t_b.reshape(1, 1).astype(jnp.float32)         # (1, 1) -> SMEM scalar
    mask_f = x_mask.astype(jnp.float32)                # (B, S) lane-dense

    kernel = functools.partial(_attention_kernel, mxu_dtype=mxu_dtype)

    outputs, weights = pl.pallas_call(
        kernel,
        out_shape=(
            jax.ShapeDtypeStruct((B, D), x.dtype),     # outputs
            jax.ShapeDtypeStruct((B, S), jnp.float32), # attention weights
        ),
        grid_spec=pltpu.PrefetchScalarGridSpec(
            num_scalar_prefetch=0,
            grid=grid,
            in_specs=[
                pl.BlockSpec((Bt, S, D), lambda b: (b, 0, 0)),   # x
                pl.BlockSpec((Bt, S), lambda b: (b, 0)),         # mask (lane-dense)
                pl.BlockSpec((D, A), lambda b: (0, 0)),          # U^T
                pl.BlockSpec((1, A), lambda b: (0, 0)),          # b_u
                pl.BlockSpec((1, A), lambda b: (0, 0)),          # T
                pl.BlockSpec(memory_space=pltpu.MemorySpace.SMEM),  # b_t scalar
            ],
            out_specs=(
                pl.BlockSpec((Bt, D), lambda b: (b, 0)),
                pl.BlockSpec((Bt, S), lambda b: (b, 0)),
            ),
        ),
        compiler_params=pltpu.CompilerParams(
            dimension_semantics=("parallel",)),
    )(x, mask_f, ut, bu, tv, bt)

    return outputs, weights


def attention_reference(x, x_mask, u_w, u_b, t_w, t_b):
    """Pure-JAX reference mirroring the PyTorch forward."""
    x_proj = jnp.einsum("bsd,ad->bsa", x, u_w) + u_b
    scores = jnp.einsum("bsa,a->bs", jnp.tanh(x_proj), t_w[0]) + t_b[0]
    scores = jnp.where(x_mask, -jnp.inf, scores)
    weights = jax.nn.softmax(scores, axis=1)
    outputs = jnp.einsum("bs,bsd->bd", weights, x)
    return outputs, weights


if __name__ == "__main__":
    # batch, seq_len, input_size, attn_size.  B=16 with Bt=8 -> grid=(2,),
    # so the parallel batch axis can shard across both v7x TensorCores.
    B, S, D, A = 16, 8, 32, 16

    key = jax.random.PRNGKey(0)
    kx, km, ku_w, ku_b, kt_w, kt_b = jax.random.split(key, 6)

    x = jax.random.normal(kx, (B, S, D), dtype=jnp.float32)
    # mask: True == masked; guarantee at least one unmasked position per row
    x_mask = jax.random.uniform(km, (B, S)) < 0.3
    x_mask = x_mask.at[:, 0].set(False)

    # Parameters (shapes from the module's __init__).  The module zero-inits
    # tlinear.weight; small deterministic normals exercise the full path.
    u_w = 0.001 * jax.random.normal(ku_w, (A, D), dtype=jnp.float32)   # ulinear.weight
    u_b = 0.01 * jax.random.normal(ku_b, (A,), dtype=jnp.float32)      # ulinear.bias
    t_w = 0.1 * jax.random.normal(kt_w, (1, A), dtype=jnp.float32)     # tlinear.weight
    t_b = 0.01 * jax.random.normal(kt_b, (1,), dtype=jnp.float32)      # tlinear.bias

    outputs, weights = attention_forward(x, x_mask, u_w, u_b, t_w, t_b)
    jax.block_until_ready((outputs, weights))

    ref_out, ref_w = attention_reference(x, x_mask, u_w, u_b, t_w, t_b)
    np.testing.assert_allclose(np.asarray(weights), np.asarray(ref_w),
                               rtol=1e-5, atol=1e-5)
    np.testing.assert_allclose(np.asarray(outputs), np.asarray(ref_out),
                               rtol=1e-5, atol=1e-5)

    print("KERNEL_OK")
</pallas_src>

<mosaic_0001>
module attributes {stable_mosaic.version = 11 : i64} {
  func.func @_attention_kernel(%arg0: i32, %arg1: memref<8x8x32xf32, #tpu.memory_space<vmem>>, %arg2: memref<8x8xf32, #tpu.memory_space<vmem>>, %arg3: memref<32x16xf32, #tpu.memory_space<vmem>>, %arg4: memref<1x16xf32, #tpu.memory_space<vmem>>, %arg5: memref<1x16xf32, #tpu.memory_space<vmem>>, %arg6: memref<1x1xf32, #tpu.memory_space<smem>>, %arg7: memref<8x32xf32, #tpu.memory_space<vmem>>, %arg8: memref<8x8xf32, #tpu.memory_space<vmem>>) attributes {dimension_semantics = [#tpu.dimension_semantics<parallel>], iteration_bounds = array<i64: 2>, scalar_prefetch = 0 : i64, scratch_operands = 0 : i64, tpu.core_type = #tpu.core_type<tc>, window_params = [{transform_indices = @transform_0, window_bounds = array<i64: 8, 8, 32>}, {transform_indices = @transform_1, window_bounds = array<i64: 8, 8>}, {pipeline_mode = #tpu.pipeline_mode<synchronous>, transform_indices = @transform_2, window_bounds = array<i64: 32, 16>}, {pipeline_mode = #tpu.pipeline_mode<synchronous>, transform_indices = @transform_3, window_bounds = array<i64: 1, 16>}, {pipeline_mode = #tpu.pipeline_mode<synchronous>, transform_indices = @transform_4, window_bounds = array<i64: 1, 16>}, {transform_indices = @transform_5, window_bounds = array<i64: 1, 1>}, {transform_indices = @transform_6, window_bounds = array<i64: 8, 32>}, {transform_indices = @transform_7, window_bounds = array<i64: 8, 8>}]} {
    %c0 = arith.constant 0 : index
    %c0_0 = arith.constant 0 : index
    %c0_1 = arith.constant 0 : index
    %0 = vector.load %arg1[%c0, %c0_0, %c0_1] : memref<8x8x32xf32, #tpu.memory_space<vmem>>, vector<8x8x32xf32>
    %1 = vector.shape_cast %0 : vector<8x8x32xf32> to vector<64x32xf32>
    %c0_2 = arith.constant 0 : index
    %c0_3 = arith.constant 0 : index
    %2 = vector.load %arg3[%c0_2, %c0_3] : memref<32x16xf32, #tpu.memory_space<vmem>>, vector<32x16xf32>
    %cst = arith.constant dense<0.000000e+00> : vector<64x16xf32>
    %3 = tpu.matmul %1, %2, %cst {dimension_numbers = #tpu.dot_dimension_numbers<[1], [0], [0], [1], [0, 0, 1, 1], [], []>} : vector<64x32xf32>, vector<32x16xf32>, vector<64x16xf32> -> vector<64x16xf32>
    %c0_4 = arith.constant 0 : index
    %c0_5 = arith.constant 0 : index
    %4 = vector.load %arg4[%c0_4, %c0_5] : memref<1x16xf32, #tpu.memory_space<vmem>>, vector<1x16xf32>
    %5 = vector.broadcast %4 : vector<1x16xf32> to vector<64x16xf32>
    %6 = arith.addf %3, %5 : vector<64x16xf32>
    %7 = math.tanh %6 : vector<64x16xf32>
    %8 = vector.shape_cast %7 : vector<64x16xf32> to vector<8x8x16xf32>
    %c0_6 = arith.constant 0 : index
    %c0_7 = arith.constant 0 : index
    %9 = vector.load %arg5[%c0_6, %c0_7] : memref<1x16xf32, #tpu.memory_space<vmem>>, vector<1x16xf32>
    %10 = vector.shape_cast %9 : vector<1x16xf32> to vector<1x1x16xf32>
    %11 = vector.broadcast %10 : vector<1x1x16xf32> to vector<8x8x16xf32>
    %12 = arith.mulf %8, %11 : vector<8x8x16xf32>
    %cst_8 = arith.constant dense<0.000000e+00> : vector<8x8xf32>
    %13 = vector.multi_reduction <add>, %12, %cst_8 [2] : vector<8x8x16xf32> to vector<8x8xf32>
    %c0_9 = arith.constant 0 : index
    %c0_10 = arith.constant 0 : index
    %14 = memref.load %arg6[%c0_9, %c0_10] : memref<1x1xf32, #tpu.memory_space<smem>>
    %15 = vector.broadcast %14 : f32 to vector<8x8xf32>
    %16 = arith.addf %13, %15 : vector<8x8xf32>
    %c0_11 = arith.constant 0 : index
    %c0_12 = arith.constant 0 : index
    %17 = vector.load %arg2[%c0_11, %c0_12] : memref<8x8xf32, #tpu.memory_space<vmem>>, vector<8x8xf32>
    %cst_13 = arith.constant 0.000000e+00 : f32
    %18 = vector.broadcast %cst_13 : f32 to vector<8x8xf32>
    %19 = arith.cmpf ogt, %17, %18 : vector<8x8xf32>
    %cst_14 = arith.constant -1.000000e+30 : f32
    %20 = vector.broadcast %cst_14 : f32 to vector<8x8xf32>
    %21 = arith.select %19, %20, %16 : vector<8x8xi1>, vector<8x8xf32>
    %cst_15 = arith.constant dense<0xFF800000> : vector<8xf32>
    %22 = vector.multi_reduction <maximumf>, %21, %cst_15 [1] : vector<8x8xf32> to vector<8xf32>
    %23 = vector.shape_cast %22 : vector<8xf32> to vector<8x1xf32>
    %24 = vector.broadcast %23 : vector<8x1xf32> to vector<8x8xf32>
    %25 = arith.subf %21, %24 : vector<8x8xf32>
    %26 = math.exp %25 : vector<8x8xf32>
    %cst_16 = arith.constant dense<0.000000e+00> : vector<8xf32>
    %27 = vector.multi_reduction <add>, %26, %cst_16 [1] : vector<8x8xf32> to vector<8xf32>
    %28 = vector.shape_cast %27 : vector<8xf32> to vector<8x1xf32>
    %29 = vector.broadcast %28 : vector<8x1xf32> to vector<8x8xf32>
    %30 = arith.divf %26, %29 : vector<8x8xf32>
    %c0_17 = arith.constant 0 : index
    %c0_18 = arith.constant 0 : index
    %31 = vector.load %arg8[%c0_17, %c0_18] : memref<8x8xf32, #tpu.memory_space<vmem>>, vector<8x8xf32>
    tpu.vector_store %arg8[%c0_17, %c0_18], %30 {strides = array<i32>} : memref<8x8xf32, #tpu.memory_space<vmem>>, vector<8x8xf32>,
    %32 = vector.shape_cast %30 : vector<8x8xf32> to vector<8x1x8xf32>
    "tpu.trace_start"() <{level = 10 : i32, message = "bks,bsd->bkd"}> : () -> ()
    %cst_19 = arith.constant dense<0.000000e+00> : vector<8x1x32xf32>
    %33 = tpu.matmul %32, %0, %cst_19 {dimension_numbers = #tpu.dot_dimension_numbers<[2], [1], [1], [2], [0, 0, 0, 1, 1, 2], [0], [0]>} : vector<8x1x8xf32>, vector<8x8x32xf32>, vector<8x1x32xf32> -> vector<8x1x32xf32>
    "tpu.trace_stop"() : () -> ()
    %34 = vector.shape_cast %33 : vector<8x1x32xf32> to vector<8x32xf32>
    %c0_20 = arith.constant 0 : index
    %c0_21 = arith.constant 0 : index
    %35 = vector.load %arg7[%c0_20, %c0_21] : memref<8x32xf32, #tpu.memory_space<vmem>>, vector<8x32xf32>
    tpu.vector_store %arg7[%c0_20, %c0_21], %34 {strides = array<i32>} : memref<8x32xf32, #tpu.memory_space<vmem>>, vector<8x32xf32>,
    return
  }
  func.func @transform_0(%arg0: i32) -> (i32, i32, i32) {
    %c0_i32 = arith.constant 0 : i32
    %c0_i32_0 = arith.constant 0 : i32
    %c0_i32_1 = arith.constant 0 : i32
    return %arg0, %c0_i32, %c0_i32_0 : i32, i32, i32
  }
  func.func @transform_1(%arg0: i32) -> (i32, i32) {
    %c0_i32 = arith.constant 0 : i32
    %c0_i32_0 = arith.constant 0 : i32
    return %arg0, %c0_i32 : i32, i32
  }
  func.func @transform_2(%arg0: i32) -> (i32, i32) {
    %c0_i32 = arith.constant 0 : i32
    %c0_i32_0 = arith.constant 0 : i32
    %c0_i32_1 = arith.constant 0 : i32
    return %c0_i32, %c0_i32_0 : i32, i32
  }
  func.func @transform_3(%arg0: i32) -> (i32, i32) {
    %c0_i32 = arith.constant 0 : i32
    %c0_i32_0 = arith.constant 0 : i32
    %c0_i32_1 = arith.constant 0 : i32
    return %c0_i32, %c0_i32_0 : i32, i32
  }
  func.func @transform_4(%arg0: i32) -> (i32, i32) {
    %c0_i32 = arith.constant 0 : i32
    %c0_i32_0 = arith.constant 0 : i32
    %c0_i32_1 = arith.constant 0 : i32
    return %c0_i32, %c0_i32_0 : i32, i32
  }
  func.func @transform_5(%arg0: i32) -> (i32, i32) {
    %c0_i32 = arith.constant 0 : i32
    %c0_i32_0 = arith.constant 0 : i32
    %c0_i32_1 = arith.constant 0 : i32
    return %c0_i32, %c0_i32_0 : i32, i32
  }
  func.func @transform_6(%arg0: i32) -> (i32, i32) {
    %c0_i32 = arith.constant 0 : i32
    %c0_i32_0 = arith.constant 0 : i32
    return %arg0, %c0_i32 : i32, i32
  }
  func.func @transform_7(%arg0: i32) -> (i32, i32) {
    %c0_i32 = arith.constant 0 : i32
    %c0_i32_0 = arith.constant 0 : i32
    return %arg0, %c0_i32 : i32, i32
  }
}

</mosaic_0001>

<bundles_post_ra>
// kernel: attention_forward.1
= control target key start
LH: loop header
LB: loop body
LE: loop exit
PB: predicated region body
PF: predicated region fallthrough
CT: control target
= control target key end

     0   :  { %s2013_s0 = inlined_call_operand.hbm [shape: f32[16,8,32], index: 0, kind: input, shape index: {}]   ;;  %s2014_s1 = inlined_call_operand.vmem [shape: f32[16,8], index: 1, kind: input, shape index: {}]   ;;  %s2015_s2 = inlined_call_operand.vmem [shape: f32[32,16], index: 2, kind: input, shape index: {}]   ;;  %s2016_s3 = inlined_call_operand.vmem [shape: f32[1,16], index: 3, kind: input, shape index: {}]   ;;  %s2017_s4 = inlined_call_operand.vmem [shape: f32[1,16], index: 4, kind: input, shape index: {}]   ;;  %s2018_s5 = inlined_call_operand.<no memory space> [shape: f32[1,1], index: 5, kind: input, shape index: {}]   ;;  %s2019_s6 = inlined_call_operand.hbm [shape: f32[16,32], index: 6, kind: output, shape index: {0}]   ;;  %s2020_s7 = inlined_call_operand.vmem [shape: f32[16,8], index: 7, kind: output, shape index: {1}]  }
   0x1   :  { %13 = sst [smem:[#allocation2]] %s2018_s5 }
   0x2   :  { %14 = vsyncpa [#allocation4], 0 }
   0x3   :  { %16 = vsyncpa [#allocation4 + $0x1], 0 }
   0x4   :  { %17 = vsyncpa [#allocation5], 0 }
   0x5   :  { %19 = vsyncpa [#allocation5 + $0x1], 0  ;;  %s1733_s26 = smov 0   ;;  %s1735_s27 = smov 0  }
   0x6   :  { %s1737_s28 = smov 0   ;;  %s1739_s29 = smov 0  }
   0x7 LB: > { %s1754_s5 = sadd.s32 4294967295, %s1681_s29   ;;  %s1384_s30 = sadd.s32 4294967294, %s1681_s29   ;;  %s1681_s29 = sphi %s1739_s29, %s2033_s29   ;;  %s1677_s28 = sphi %s1737_s28, %s2032_s28   ;;  %s1673_s27 = sphi %s1735_s27, %s2031_s27   ;;  %s1669_s26 = sphi %s1733_s26, %s2030_s26  }
   0x8   : > { %s1758_s8 = sadd.s32 1, %s1681_s29   ;;  %s32_s9 = sadd.s32 1, %s1677_s28 }
   0x9   : > { %s29_s10 = ssub.s32 %s1681_s29, %s1758_s8  ;;  %p39_p0 = scmp.ne.s32.totalorder %s1677_s28, %s1673_s27 }
   0xa   : > { %p30_p1 = scmp.eq.s32.totalorder %s29_s10, 0  ;;  %p40_p2 = scmp.eq.s32.totalorder %s1681_s29, 0 }
   0xb   : > { %p45_p3 = scmp.ne.s32.totalorder %s1673_s27, %s1669_s26  ;;  %p46_p4 = scmp.eq.s32.totalorder %s1754_s5, 0 }
   0xc   : > { %s1770_s11 = scalar_select %p30_p1, %s1677_s28, %s32_s9  }
   0xd   : > { %p1772_p5 = por %p40_p2, %p39_p0  ;;  %p1776_p6 = por %p46_p4, %p45_p3 }
   0xe   : > { %p179_p7 = scmp.eq.s32.totalorder %s1754_s5, 1  ;;  %p185_p8 = scmp.eq.s32.totalorder %s1384_s30, 1 }
   0xf   : > { %p1526_p10 = scmp.lt.s32.totalorder %s1681_s29, 2  ;;  %s243_s16 = sand.u32 1, %s1677_s28  }
  0x10   : > { %p1783_p11 = por %p179_p7, %p39_p0  ;;  %p1787_p12 = por %p185_p8, %p45_p3 }
  0x11   : > { %s1417_s17 = sshll.u32 %s1681_s29, 10  ;;  %s1387_s18 = sshll.u32 %s243_s16, 6 }
  0x12   : > { %s2024_s14 = scalar_select %p1783_p11, 1, 0 }
  0x13   : > { %s2025_s15 = scalar_select %p1787_p12, 1, 0 }
  0x14   : > { %s1796_s21 = scalar_lea.hbm %s2013_s0, %s1417_s17  ;;  %s247_s22 = scalar_lea.vmem [#allocation3], %s1387_s18 }
  0x15   : > { %s254_s23 = sshll.u32 %s247_s22, 4  ;;  %p1800_p13 = pnand %p1526_p10, %p1772_p5  ;;  %s1804_s23 = int_to_ptr.vmem [resolvable:$true] %s254_s23 }
  0x16   : > { %s1806_s25 = scalar_lea.sflag [#allocation4], %s243_s16  ;;  %s1585_s30 = scalar_lea.hbm %s1796_s21, 1024 }
  0x17   : > { %p1586_p0 = scmp.ne.s32.totalorder %s1796_s21, %s1585_s30  ;;  %p1587_p1 = pneg %p1800_p13 }
  0x18   : > { %s1590_s12 = scalar_lea.hbm %s2013_s0, 2048  ;;  %p1591_p4 = scmp.lt.u32.totalorder %s1796_s21, %s2013_s0 }
  0x19   : > { %p1588_p2 = pnand %p1587_p1, %p1586_p0  ;;  %p1592_p5 = scmp.lt.u32.totalorder %s1590_s12, %s1585_s30 }
  0x1a   : > { %p1594_p8 = scmp.lt.u32.totalorder %s1585_s30, %s1796_s21 }
  0x1b   : > { %p1589_p3 = pneg %p1588_p2  ;;  %p1593_p7 = por %p1592_p5, %p1591_p4 }
  0x1d   : > { %p1595_p10 = por %p1594_p8, %p1593_p7 }
  0x1f   : > { %p1596_p9 = pnand %p1595_p10, %p1589_p3 }
  0x21   : > { %1599 = shalt.err (!%p1596_p9)
}
  0x22   : > { %s1600_s16 = scalar_lea.vmem %s1804_s23, 1024  ;;  %s1683_s19 = smov [#allocation3]  }
  0x23   : > { %p1601_p0 = scmp.ne.s32.totalorder %s1804_s23, %s1600_s16  ;;  %s1605_s20 = sshll.u32 %s1683_s19, 4  ;;  %s1606_s20 = int_to_ptr.vmem [resolvable:$false] %s1605_s20 }
  0x24   : > { %s1607_s22 = scalar_lea.vmem %s1606_s20, 2048  ;;  %p1608_p11 = scmp.lt.s32.totalorder %s1804_s23, %s1606_s20 }
  0x25   : > { %p1603_p2 = pnand %p1601_p0, %p1587_p1  ;;  %p1609_p4 = scmp.lt.s32.totalorder %s1607_s22, %s1600_s16 }
  0x27   : > { %p1604_p12 = pneg %p1603_p2  ;;  %p1610_p5 = por %p1609_p4, %p1608_p11 }
  0x29   : > { %p1611_p7 = pnand %p1610_p5, %p1604_p12 }
  0x2b   : > { %1614 = shalt.err (!%p1611_p7)
}
  0x2c   : > { %s1684_s30 = smov 128   ;;  %s1685_s9 = smov 8  }
  0x2d   : > { %1521 = dma.hbm_to_vmem [thread:$0]  (!%p1800_p13), %s1796_s21, 1024, %s1804_s23, %s1806_s25, %s1684_s30, %s1684_s30, %s1685_s9  }
  0x2e   : > { %p1390_p9 = scmp.ge.s32.totalorder %s1681_s29, 1  ;;  %p269_p1 = scmp.lt.s32.totalorder %s1681_s29, 3 }
  0x30   : > { %p270_p3 = pnand %p1390_p9, %p269_p1 }
  0x31   : > { %s1837_s10 = sand.u32 (!%p270_p3), 1, %s1673_s27  }
  0x32   : > { %273 = sbr.rel (%p270_p3) target bundleno = 1032 (0x408), region = 44  ;;  %s1391_s12 = sshll.u32 (!%p270_p3), %s1837_s10, 6 }
  0x33   : > { %s276_s17 = scalar_lea.sflag (!%p270_p3), [#allocation4], %s1837_s10  ;;  %s279_s18 = scalar_lea.vmem (!%p270_p3), [#allocation3], %s1391_s12 }
  0x39   : > { %1660 = dma.done.wait (%p1776_p6), %s276_s17, 1024  }
  0x3a   : > { %1662 = vsyncadd (%p1776_p6), %s276_s17, 4294966272  ;;  %vm346_vm0 = vcmask 261120   ;;  %v335_v0 = vld [vmem:[%s2015_s2] sm:$0xff]  ;;  %v336_v1 = vld [vmem:[%s2015_s2 + $0x8] sm:$0xff]  ;;  %vm499_vm1 = vcmask 130048   ;;  %s524_s17 = sld [smem:[#allocation2]]  ;;  %v544_v56 = vlaneseq }
  0x3b   : > { %v337_v2 = vld [vmem:[%s2015_s2 + $0x10] sm:$0xff]  ;;  %v1506_v3 = vpack.c.bf16 %v336_v1, %v335_v0  ;;  %v338_v4 = vld [vmem:[%s2015_s2 + $0x18] sm:$0xff]  ;;  %v1857_v5 = vld [vmem:[%s279_s18] sm:$0xff]  ;;  %p319_p6 = scmp.lt.s32.totalorder %s1754_s5, 1  ;;  %vm578_vm2 = vcmask 1041409   ;;  %vm580_vm3 = vcmask 1042434  }
  0x3c   : > { %v1510_v6 = vpack.c.bf16 %v338_v4, %v337_v2  ;;  %1454 = vmatprep.mubr.msk.f32.mxu0 %vm346_vm0, %v1857_v5  ;;  %v1861_v7 = vld [vmem:[%s279_s18 + $0x8] sm:$0xff]  ;;  %v1863_v8 = vld [vmem:[%s279_s18 + $0x10] sm:$0xff]  ;;  %v1869_v9 = vld [vmem:[%s279_s18 + $0x18] sm:$0xff]  ;;  %v545_v58 = vand.u32 127, %v544_v56  ;;  %v1903_v59 = vshrl.u32 %v544_v56, 7  ;;  %vm582_vm4 = vcmask 1043459  }
  0x3d   : > { %1507 = vmatprep.subr.bf16.mxu0 %v1506_v3  ;;  %v1871_v10 = vld [vmem:[%s279_s18 + $0x20] sm:$0xff]  ;;  %v1877_v11 = vld [vmem:[%s279_s18 + $0x28] sm:$0xff]  ;;  %v1879_v12 = vld [vmem:[%s279_s18 + $0x30] sm:$0xff]  ;;  %vm584_vm5 = vcmask 1044484   ;;  %vm586_vm6 = vcmask 1045509   ;;  %vm588_vm7 = vcmask 1046534  }
  0x3e   : > { %1509 = vmatpush3.bf16.msra.mxu0 %v1506_v3  ;;  %v1885_v13 = vld [vmem:[%s279_s18 + $0x38] sm:$0xff]  ;;  %v1395_v14 = vld [vmem:[%s2016_s3] ss:$0 sm:$0xff]  ;;  %v548_v0 = vsub.s32 %v545_v58, %v1903_v59  ;;  %s1908_s18 = scalar_select %p319_p6, %s1754_s5, 1  ;;  %vm590_vm8 = vcmask 1047559   ;;  %vm594_vm10 = vcmask 64512  }
  0x3f   : > { %1511 = vmatprep.subr.bf16.mxu0 %v1510_v6  ;;  %v1404_v27 = vld [vmem:[%s2017_s4] ss:$0 sm:$0xff]  ;;  %vm1687_vm11 = vmmov 0   ;;  %s1392_s22 = sshll.u32 %s1837_s10, 3  ;;  %s1414_s13 = sshll.u32 %s1754_s5, 7 }
  0x40   : > { %v525_v60 = vstv %s524_s17  ;;  %s1393_s21 = sshll.u32 %s1908_s18, 3  ;;  %s311_s30 = scalar_lea.vmem [#allocation6], %s1392_s22 }
  0x41   : > { %s322_s25 = scalar_lea.vmem %s2014_s1, %s1393_s21  ;;  %s326_s20 = scalar_lea.vmem %s2020_s7, %s1393_s21 }
  0x42   : > { %1513 = vmatpush3.bf16.msra.mxu0 %v1510_v6  ;;  %s1275_s9 = sshll.u32 %s311_s30, 4  ;;  %s1967_s18 = scalar_lea.hbm %s2019_s6, %s1414_s13  ;;  %s1969_s9 = int_to_ptr.vmem [resolvable:$true] %s1275_s9 }
  0x43   : > { %s1258_s5 = scalar_lea.sflag [#allocation5], %s1837_s10  ;;  %s1615_s21 = scalar_lea.vmem %s1969_s9, 128 }
  0x44   : > { %p1616_p11 = scmp.ne.s32.totalorder %s1969_s9, %s1615_s21  ;;  %p2027_p12 = scmp.ne.s32.totalorder %s2024_s14, 0 }
  0x45   : > { %1455 = vmatmul.mubr.msk.f32.vlgmr.msra.gmra.mrb[0].mxu0 %vm346_vm0, %v1861_v7  ;;  %s1689_s23 = smov [#allocation6]  }
  0x46   : > { %1457 = vmatprep.mubr.msk.f32.mxu0 %vm346_vm0, %v1863_v8  ;;  %p1617_p13 = pnand %p1616_p11, %p2027_p12  ;;  %s1619_s24 = sshll.u32 %s1689_s23, 4  ;;  %s1620_s24 = int_to_ptr.vmem [resolvable:$false] %s1619_s24 }
  0x47   : > { %p1622_p10 = scmp.lt.s32.totalorder %s1969_s9, %s1620_s24 }
  0x48   : > { %p1618_p8 = pneg %p1617_p13 }
  0x49   : > { %1458 = vmatmul.mubr.msk.f32.gmra.mrb[2].mxu0 %vm346_vm0, %v1869_v9 }
  0x4a   : > { %1460 = vmatprep.mubr.msk.f32.mxu0 %vm346_vm0, %v1871_v10 }
  0x4d   : > { %1461 = vmatmul.mubr.msk.f32.gmra.mrb[4].mxu0 %vm346_vm0, %v1877_v11 }
  0x4e   : > { %1463 = vmatprep.mubr.msk.f32.mxu0 %vm346_vm0, %v1879_v12 }
  0x51   : > { %1464 = vmatmul.mubr.msk.f32.gmra.mrb[6].mxu0 %vm346_vm0, %v1885_v13 }
 0x118   : > { %v1456_v15 = vpop.f32.mrb[0].mxu0 }
 0x119   : > { %v443_v16 = vadd.f32 %v1456_v15, %v1395_v14  ;;  %v437_v17 = vpop.f32.mrb[1].mxu0 }
 0x11a   : > { %v438_v18 = vadd.f32 %v1395_v14, %v437_v17 }
 0x11b   : > { %1565 = vtanh.f32 %v443_v16 }
 0x11c   : > { %1567 = vtanh.f32 %v438_v18  ;;  %v1459_v19 = vpop.f32.mrb[2].mxu0 }
 0x11d   : > { %v453_v20 = vadd.f32 %v1459_v19, %v1395_v14  ;;  %v447_v21 = vpop.f32.mrb[3].mxu0 }
 0x11e   : > { %v448_v22 = vadd.f32 %v1395_v14, %v447_v21 }
 0x11f   : > { %1569 = vtanh.f32 %v453_v20 }
 0x120   : > { %1571 = vtanh.f32 %v448_v22  ;;  %v1462_v23 = vpop.f32.mrb[4].mxu0 }
 0x121   : > { %v463_v24 = vadd.f32 %v1462_v23, %v1395_v14  ;;  %v457_v25 = vpop.f32.mrb[5].mxu0 }
 0x122   : > { %v458_v26 = vadd.f32 %v1395_v14, %v457_v25 }
 0x123   : > { %1573 = vtanh.f32 %v463_v24 }
 0x124   : > { %1575 = vtanh.f32 %v458_v26  ;;  %v1465_v28 = vpop.f32.mrb[6].mxu0 }
 0x125   : > { %v1566_v29 = vpop.eup %1565  ;;  %v473_v30 = vadd.f32 %v1465_v28, %v1395_v14  ;;  %v467_v31 = vpop.f32.mrb[7].mxu0 }
 0x126   : > { %v1568_v32 = vpop.eup %1567  ;;  %v468_v33 = vadd.f32 %v1395_v14, %v467_v31  ;;  %v492_v34 = vmul.f32 %v1566_v29, %v1404_v27  ;;  %v534_v31 = vld [vmem:[%s322_s25] sm:$0xff]  ;;  %s1621_s25 = scalar_lea.vmem %s1620_s24, 256 }
 0x127   : > { %1577 = vtanh.f32 %v473_v30  ;;  %v491_v36 = vmul.f32 %v1568_v32, %v1404_v27  ;;  %vm535_vm9 = vcmp.gt.f32.partialorder %v534_v31, 0.0  ;;  %p1623_p0 = scmp.lt.s32.totalorder %s1621_s25, %s1615_s21 }
 0x128   : > { %1579 = vtanh.f32 %v468_v33  ;;  %v503_v35 = vsel %vm499_vm1, %v492_v34, 0.0 }
 0x129   : > { %v1570_v37 = vpop.eup %1569  ;;  %504 = vadd.xlane.f32.xlu0 %v503_v35  ;;  %v500_v41 = vsel %vm499_vm1, %v491_v36, 0.0  ;;  %p1624_p2 = por %p1623_p0, %p1622_p10 }
 0x12a   : > { %v1572_v38 = vpop.eup %1571  ;;  %v494_v39 = vmul.f32 %v1570_v37, %v1404_v27 }
 0x12b   : > { %v493_v42 = vmul.f32 %v1572_v38, %v1404_v27  ;;  %p1625_p4 = pnand %p1624_p2, %p1618_p8 }
 0x12c   : > { %v509_v40 = vsel %vm499_vm1, %v494_v39, 0.0 }
 0x12d   : > { %v1574_v43 = vpop.eup %1573  ;;  %510 = vadd.xlane.f32.xlu1 %v509_v40  ;;  %501 = vadd.xlane.f32.xlu0 %v500_v41  ;;  %v506_v46 = vsel %vm499_vm1, %v493_v42, 0.0 }
 0x12e   : > { %v1576_v44 = vpop.eup %1575  ;;  %v496_v47 = vmul.f32 %v1574_v43, %v1404_v27 }
 0x12f   : > { %v495_v45 = vmul.f32 %v1576_v44, %v1404_v27  ;;  %v1686_v44 = vmov 0.0  }
 0x130   : > { %v515_v52 = vsel %vm499_vm1, %v496_v47, 0.0  ;;  %1466 = vmatprep.subr.mxu1 %v1686_v44  ;;  %1496 = vmatprep.subr.mxu0 %v1686_v44 }
 0x131   : > { %v1578_v48 = vpop.eup %1577  ;;  %507 = vadd.xlane.f32.xlu1 %v506_v46  ;;  %v512_v49 = vsel %vm499_vm1, %v495_v45, 0.0  ;;  %1467 = vmatpush3.msra.mxu1 %v1857_v5  ;;  %v1688_v46 = vmov 1966171168  }
 0x132   : > { %v1580_v50 = vpop.eup %1579  ;;  %513 = vadd.xlane.f32.xlu0 %v512_v49  ;;  %v498_v53 = vmul.f32 %v1578_v48, %v1404_v27  ;;  %1468 = vmatprep.mubr.msk.f32.mxu1 %vm1687_vm11, %v1686_v44  ;;  %v610_v47 = vunpack.c.l.s4 %v1688_v46 }
 0x133   : > { %v497_v51 = vmul.f32 %v1580_v50, %v1404_v27  ;;  %1471 = vmatprep.subr.mxu1 %v1686_v44  ;;  %1497 = vmatpush3.msra.mxu0 %v1879_v12 }
 0x134   : > { %v521_v55 = vsel %vm499_vm1, %v498_v53, 0.0  ;;  %1498 = vmatprep.mubr.msk.f32.mxu0 %vm1687_vm11, %v1686_v44  ;;  %v611_v48 = vunpack.c.0.s8 %v610_v47 }
 0x135   : > { %516 = vadd.xlane.f32.xlu1 %v515_v52  ;;  %v518_v54 = vsel %vm499_vm1, %v497_v51, 0.0 }
 0x136   : > { %519 = vadd.xlane.f32.xlu0 %v518_v54  ;;  %v614_v49 = vsub.s32 %v611_v48, %v1903_v59 }
 0x139   : > { %522 = vadd.xlane.f32.xlu1 %v521_v55 }
 0x1b6   : > { %v505_v57 = vpop.xlane.xlu0 %504 }
 0x1b7   : > { %v527_v1 = vadd.f32 %v525_v60, %v505_v57 }
 0x1b9   : > { %v553_v15 = vrot.slane %v527_v1, %v548_v0 }
 0x1ba   : > { %v511_v61 = vpop.xlane.xlu1 %510  ;;  %v502_v62 = vpop.xlane.xlu0 %501 }
 0x1bb   : > { %v526_v63 = vadd.f32 %v525_v60, %v502_v62  ;;  %v529_v2 = vadd.f32 %v525_v60, %v511_v61 }
 0x1bd   : > { %v549_v3 = vrot.slane %v526_v63, %v548_v0  ;;  %v561_v18 = vrot.slane %v529_v2, %v548_v0 }
 0x1be   : > { %v508_v4 = vpop.xlane.xlu1 %507 }
 0x1bf   : > { %v528_v6 = vadd.f32 %v525_v60, %v508_v4  ;;  %v514_v14 = vpop.xlane.xlu0 %513  ;;  %v579_v19 = vsel %vm578_vm2, %v553_v15, %v549_v3 }
 0x1c0   : > { %v530_v16 = vadd.f32 %v525_v60, %v514_v14 }
 0x1c1   : > { %v557_v17 = vrot.slane %v528_v6, %v548_v0 }
 0x1c2   : > { %v565_v20 = vrot.slane %v530_v16, %v548_v0  ;;  %v517_v21 = vpop.xlane.xlu1 %516 }
 0x1c3   : > { %v581_v22 = vsel %vm580_vm3, %v557_v17, %v579_v19  ;;  %v531_v23 = vadd.f32 %v525_v60, %v517_v21  ;;  %v520_v24 = vpop.xlane.xlu0 %519 }
 0x1c4   : > { %v583_v25 = vsel %vm582_vm4, %v561_v18, %v581_v22  ;;  %v532_v26 = vadd.f32 %v525_v60, %v520_v24 }
 0x1c5   : > { %v585_v27 = vsel %vm584_vm5, %v565_v20, %v583_v25  ;;  %v569_v28 = vrot.slane %v531_v23, %v548_v0 }
 0x1c6   : > { %v573_v29 = vrot.slane %v532_v26, %v548_v0  ;;  %v523_v30 = vpop.xlane.xlu1 %522 }
 0x1c7   : > { %v533_v32 = vadd.f32 %v525_v60, %v523_v30  ;;  %v587_v33 = vsel %vm586_vm6, %v569_v28, %v585_v27 }
 0x1c8   : > { %v589_v35 = vsel %vm588_vm7, %v573_v29, %v587_v33 }
 0x1c9   : > { %v577_v34 = vrot.slane %v533_v32, %v548_v0 }
 0x1cb   : > { %v591_v36 = vsel %vm590_vm8, %v577_v34, %v589_v35 }
 0x1cc   : > { %v593_v37 = vsel %vm535_vm9, -1e+30, %v591_v36 }
 0x1cd   : > { %v595_v38 = vsel %vm594_vm10, %v593_v37, -inf }
 0x1ce   : > { %596 = vmax.xlane.f32.xlu0 %v595_v38 }
 0x25b   : > { %v597_v39 = vpop.xlane.xlu0 %596 }
 0x25c   : > { %v598_v40 = vsub.f32 %v593_v37, %v597_v39 }
 0x25e   : > { %v599_v41 = vmul.f32 1.442695, %v598_v40 }
 0x260   : > { %1581 = vpow2.f32 %v599_v41 }
 0x26a   : > { %v1582_v42 = vpop.eup %1581 }
 0x26b   : > { %v601_v43 = vsel %vm594_vm10, %v1582_v42, 0.0 }
 0x26c   : > { %602 = vadd.xlane.f32.xlu1 %v601_v43 }
 0x2f9   : > { %v603_v45 = vpop.xlane.xlu1 %602 }
 0x2fa   : > { %1583 = vrcp.f32 %v603_v45 }
 0x304   : > { %v1584_v50 = vpop.eup %1583 }
 0x305   : > { %v605_v5 = vmul.f32 %v1584_v50, %v1582_v42 }
 0x307   : > { %606 = vst.msk [vmem:[%s326_s20] sm:$0xff] %vm594_vm10, %v605_v5  ;;  %v608_v51 = vcombine.high %v605_v5, %v605_v5  ;;  %v615_v12 = vrot.slane %v605_v5, %v614_v49 }
 0x309   : > { %v622_v52 = vrot.slane %v608_v51, %v614_v49  ;;  %v623_v53 = vcombine.high %v615_v12, %v615_v12  ;;  %v631_v54 = vrot.slane %v615_v12, %v614_v49 }
 0x30b   : > { %v638_v55 = vrot.slane %v622_v52, %v614_v49  ;;  %1469 = vmatmul.mubr.msk.f32.vlgmr.msra.gmra.mrb[0].mxu1 %vm594_vm10, %v631_v54  ;;  %v645_v56 = vrot.slane %v623_v53, %v614_v49  ;;  %v653_v58 = vcombine.high %v631_v54, %v631_v54 }
 0x30c   : > { %1472 = vmatpush3.msra.mxu1 %v1861_v7  ;;  %1473 = vmatprep.mubr.msk.f32.mxu1 %vm1687_vm11, %v1686_v44 }
 0x30d   : > { %1476 = vmatprep.subr.mxu1 %v1686_v44  ;;  %v654_v57 = vcombine.high %v638_v55, %v638_v55  ;;  %v655_v7 = vcombine.high %v645_v56, %v645_v56 }
 0x30f   : > { %1474 = vmatmul.mubr.msk.f32.vlgmr.msra.gmra.mrb[2].mxu1 %vm594_vm10, %v645_v56  ;;  %1499 = vmatmul.mubr.msk.f32.vlgmr.msra.gmra.mrb[8].mxu0 %vm594_vm10, %v654_v57 }
 0x310   : > { %1477 = vmatpush3.msra.mxu1 %v1863_v8  ;;  %1478 = vmatprep.mubr.msk.f32.mxu1 %vm1687_vm11, %v1686_v44  ;;  %v624_v8 = vcombine.high %v622_v52, %v622_v52 }
 0x311   : > { %1481 = vmatprep.subr.mxu1 %v1686_v44 }
 0x313   : > { %1479 = vmatmul.mubr.msk.f32.vlgmr.msra.gmra.mrb[4].mxu1 %vm594_vm10, %v653_v58 }
 0x314   : > { %1482 = vmatpush3.msra.mxu1 %v1869_v9  ;;  %1483 = vmatprep.mubr.msk.f32.mxu1 %vm1687_vm11, %v1686_v44  ;;  %v652_v9 = vrot.slane %v624_v8, %v614_v49 }
 0x315   : > { %1486 = vmatprep.subr.mxu1 %v1686_v44 }
 0x316   : > { %v656_v59 = vcombine.high %v652_v9, %v652_v9 }
 0x317   : > { %1484 = vmatmul.mubr.msk.f32.vlgmr.msra.gmra.mrb[6].mxu1 %vm594_vm10, %v655_v7 }
 0x318   : > { %1487 = vmatpush3.msra.mxu1 %v1871_v10  ;;  %1488 = vmatprep.mubr.msk.f32.mxu1 %vm1687_vm11, %v1686_v44 }
 0x319   : > { %1491 = vmatprep.subr.mxu1 %v1686_v44 }
 0x31b   : > { %1489 = vmatmul.mubr.msk.f32.vlgmr.msra.gmra.mrb[8].mxu1 %vm594_vm10, %v638_v55 }
 0x31c   : > { %1492 = vmatpush3.msra.mxu1 %v1877_v11  ;;  %1493 = vmatprep.mubr.msk.f32.mxu1 %vm1687_vm11, %v1686_v44 }
 0x31d   : > { %1501 = vmatprep.subr.mxu1 %v1686_v44 }
 0x31f   : > { %1494 = vmatmul.mubr.msk.f32.vlgmr.msra.gmra.mrb[10].mxu1 %vm594_vm10, %v652_v9 }
 0x320   : > { %1502 = vmatpush3.msra.mxu1 %v1885_v13  ;;  %1503 = vmatprep.mubr.msk.f32.mxu1 %vm1687_vm11, %v1686_v44 }
 0x323   : > { %1504 = vmatmul.mubr.msk.f32.vlgmr.msra.gmra.mrb[12].mxu1 %vm594_vm10, %v656_v59 }
 0x3de   : > { %v725_v10 = vpop.f32.mrb[0].mxu1 }
 0x3df   : > { %v1470_v60 = vpop.f32.mrb[1].mxu1 }
 0x3e2   : > { %v797_v61 = vpop.f32.mrb[2].mxu1  ;;  %v1157_v62 = vpop.f32.mrb[8].mxu0 }
 0x3e3   : > { %v1241_v63 = vrot.slane %v797_v61, 7  ;;  %v1475_v11 = vpop.f32.mrb[3].mxu1  ;;  %v1500_v0 = vpop.f32.mrb[9].mxu0  ;;  %v1251_v24 = vrot.slane %v1157_v62, 2 }
 0x3e5   : > { %v1242_v1 = vsel %vm578_vm2, %v1241_v63, %v725_v10 }
 0x3e6   : > { %v869_v2 = vpop.f32.mrb[4].mxu1 }
 0x3e7   : > { %v1243_v3 = vrot.slane %v869_v2, 6  ;;  %v1480_v4 = vpop.f32.mrb[5].mxu1 }
 0x3e9   : > { %v1244_v13 = vsel %vm580_vm3, %v1243_v3, %v1242_v1 }
 0x3ea   : > { %v941_v6 = vpop.f32.mrb[6].mxu1 }
 0x3eb   : > { %v1245_v14 = vrot.slane %v941_v6, 5  ;;  %v1485_v15 = vpop.f32.mrb[7].mxu1 }
 0x3ed   : > { %v1246_v16 = vsel %vm582_vm4, %v1245_v14, %v1244_v13 }
 0x3ee   : > { %v1013_v17 = vpop.f32.mrb[8].mxu1 }
 0x3ef   : > { %v1247_v18 = vrot.slane %v1013_v17, 4  ;;  %v1490_v19 = vpop.f32.mrb[9].mxu1 }
 0x3f1   : > { %v1248_v20 = vsel %vm584_vm5, %v1247_v18, %v1246_v16 }
 0x3f2   : > { %v1085_v21 = vpop.f32.mrb[10].mxu1 }
 0x3f3   : > { %v1249_v22 = vrot.slane %v1085_v21, 3  ;;  %v1495_v23 = vpop.f32.mrb[11].mxu1 }
 0x3f5   : > { %v1250_v25 = vsel %vm586_vm6, %v1249_v22, %v1248_v20 }
 0x3f6   : > { %v1229_v26 = vpop.f32.mrb[12].mxu1  ;;  %v1252_v27 = vsel %vm588_vm7, %v1251_v24, %v1250_v25 }
 0x3f7   : > { %v1253_v28 = vrot.slane %v1229_v26, 1  ;;  %v1505_v29 = vpop.f32.mrb[13].mxu1 }
 0x3f9   : > { %v1254_v30 = vsel %vm590_vm8, %v1253_v28, %v1252_v27 }
 0x3fa   : > { %1256 = vst.msk [vmem:[%s311_s30] sm:$0xff] %vm346_vm0, %v1254_v30 }
 0x3fb   : > { %1628 = shalt.err (!%p1625_p4)
}
 0x3fc   : > { %s1629_s10 = scalar_lea.hbm %s1967_s18, 128  ;;  %s1633_s20 = scalar_lea.hbm %s2019_s6, 256 }
 0x3fd   : > { %p1630_p5 = scmp.ne.s32.totalorder %s1967_s18, %s1629_s10  ;;  %p1634_p1 = scmp.lt.u32.totalorder %s1967_s18, %s2019_s6 }
 0x3fe   : > { %p1635_p3 = scmp.lt.u32.totalorder %s1633_s20, %s1629_s10  ;;  %p1637_p11 = scmp.lt.u32.totalorder %s1629_s10, %s1967_s18 }
 0x3ff   : > { %p1631_p7 = pnand %p1630_p5, %p2027_p12 }
 0x400   : > { %p1636_p6 = por %p1635_p3, %p1634_p1 }
 0x401   : > { %p1632_p9 = pneg %p1631_p7 }
 0x402   : > { %p1638_p13 = por %p1637_p11, %p1636_p6 }
 0x404   : > { %p1639_p8 = pnand %p1638_p13, %p1632_p9 }
 0x406   : > { %1642 = shalt.err (!%p1639_p8)
}
 0x407   : > { %1516 = dma.vmem_to_hbm [thread:$0]  (%p2027_p12), %s1969_s9, 128, %s1967_s18, %s1258_s5  }
 0x408 PF: > { %s1290_s30 = sand.u32 1, %s1669_s26   ;;  %p2028_p10 = scmp.ne.s32.totalorder %s2025_s15, 0 }
 0x409   : > { %p2029_p0 = scmp.ge.s32.totalorder %s1681_s29, 2  ;;  %s1291_s12 = scalar_lea.sflag [#allocation5], %s1290_s30 }
 0x40b   : > { %p1523_p2 = pnand %p2029_p0, %p2028_p10 }
 0x40d   : > { %1664 = dma.done.wait (!%p1523_p2), %s1291_s12, 128  }
 0x40e   : > { %1666 = vsyncadd (!%p1523_p2), %s1291_s12, 4294967168  ;;  %p22_p4 = scmp.ge.s32.totalorder %s1758_s8, 4   ;;  %s2030_s26 = smov %s1673_s27 }
 0x40f   : > { %s2031_s27 = smov %s1677_s28  ;;  %s2032_s28 = smov %s1770_s11 }
 0x410   : > { %s2033_s29 = smov %s1758_s8  ;;  %24 = sbr.rel (!%p22_p4) target bundleno = 7 (0x7), region = 104 }
 0x417   :  { %1303 = vsyncpa [#allocation4], 1 }
 0x418   :  { %1305 = vsyncpa [#allocation4 + $0x1], 1 }
 0x419   :  { %1306 = vsyncpa [#allocation5], 1 }
 0x41a   :  { %1308 = vsyncpa [#allocation5 + $0x1], 1 }

</bundles_post_ra>
